<compile_context>
chip_gen: v7x
topology: tpu7x:2x2x1
jax: 0.10.0
libtpu: 0.0.40
codegen_flags: <defaults>
</compile_context>

<pallas_src>
import functools
import math

import jax
import jax.numpy as jnp
from jax import lax
from jax.experimental import pallas as pl
from jax.experimental.pallas import tpu as pltpu

_LANE = 128
_SUBLANE = 8
_NEG_BIG = -1e30  # softmax pad-lane bias: exp underflows to exactly 0


def _round_up(x, m):
    return ((x + m - 1) // m) * m


def _congosition_kernel(x_ref, w1_ref, b1_ref, w2_ref, b2_ref, o_ref, acc_ref,
                        *, inv_s, seq_len, ts):
    s = pl.program_id(1)
    ns = pl.num_programs(1)

    @pl.when(s == 0)
    def _init():
        acc_ref[...] = jnp.zeros_like(acc_ref)

    def _accumulate(mask_tail):
        xb = x_ref[...].astype(jnp.float32)            # (tb, ts, D)
        if mask_tail:
            # Zero rows past the true sequence length (their VMEM contents are
            # undefined for the partial last sequence block).
            row = s * ts + lax.broadcasted_iota(jnp.int32, xb.shape[1:], 0)
            xb = jnp.where((row < seq_len)[None, :, :], xb, 0.0)
        acc_ref[...] += jnp.sum(xb, axis=1)

    if seq_len % ts != 0:
        @pl.when(s == ns - 1)
        def _tail():
            _accumulate(True)

        @pl.when(s != ns - 1)
        def _body():
            _accumulate(False)
    else:
        _accumulate(False)

    @pl.when(s == ns - 1)
    def _epilogue():
        xm = acc_ref[...] * inv_s                      # mean over true S, f32

        # dense: Linear(D, D) + ReLU.  W1 is pre-transposed to [in, out] so the
        # contraction is canonical (no in-kernel transpose); LHS is cast to the
        # weight's native dtype so bf16 weights hit the native MXU path.
        w1 = w1_ref[...]
        h = jnp.dot(xm.astype(w1.dtype), w1, preferred_element_type=jnp.float32)
        h = jnp.maximum(h + b1_ref[...], 0.0)

        # dense2: Linear(D, N) on the lane-dense (padded-to-128) output.
        w2 = w2_ref[...]
        logits = jnp.dot(h.astype(w2.dtype), w2, preferred_element_type=jnp.float32)
        logits = logits + b2_ref[...]

        # Numerically stable softmax (pad lanes hold -1e30 -> exp == 0).
        logits = logits - jnp.max(logits, axis=-1, keepdims=True)
        e = jnp.exp(logits)
        denom = jnp.sum(e, axis=-1, keepdims=True)
        r = pl.reciprocal(denom, approx=True)
        r = r * (2.0 - denom * r)          # one Newton step -> ~f32 accuracy
        o_ref[...] = (e * r).astype(o_ref.dtype)


def congosition_v1(x, w1, b1, w2, b2, *, tb=None, ts=None):
    """x: [B, S, D]; w1: [D, D]; b1: [D]; w2: [N, D]; b2: [N] -> softmax [B, N]."""
    B, S, D = x.shape
    N = w2.shape[0]
    Np = _round_up(max(N, _LANE), _LANE)

    x_item = jnp.dtype(x.dtype).itemsize
    w_item = jnp.dtype(w1.dtype).itemsize

    # Sub-32-bit dtypes pack 2/4 rows per sublane row: round ts accordingly.
    pack = _SUBLANE * max(1, 4 // x_item)

    # Batch tile: multiple of 8 (or == B); default gives >= 2 tiles whenever
    # B > 8 so both v7x TensorCores get work, capped at 256 for v6e MXU rows.
    if tb is None:
        tb = min(256, _round_up(max(1, (B + 1) // 2), _SUBLANE))
    tb = min(_round_up(tb, _SUBLANE), B)               # == B (full dim) if B < 8*k

    # Sequence tile: ~6 MiB per x block (double-buffered by BlockSpec).  If the
    # whole sequence fits, ts == S -> one contiguous S*D DMA run per batch row.
    if ts is None:
        budget = 6 * 1024 * 1024
        ts = budget // max(1, tb * D * x_item)
        ts = max(pack, (ts // pack) * pack)
    else:
        ts = _round_up(ts, pack)
    if ts >= S:
        ts = S                                          # full-dim exception

    grid = (pl.cdiv(B, tb), pl.cdiv(S, ts))

    # ---- one-time wrapper-side weight prep (no padding of x!) ----
    # Pre-transpose to [in, out]; keep native dtype (bf16 stays bf16).
    w1t = jnp.asarray(w1).T                             # [D, D]
    w2t = jnp.pad(jnp.asarray(w2), ((0, Np - N), (0, 0))).T   # [D, Np], pad rows 0
    b1p = jnp.asarray(b1, jnp.float32).reshape(1, D)
    b2p = jnp.concatenate(
        [jnp.asarray(b2, jnp.float32),
         jnp.full((Np - N,), _NEG_BIG, jnp.float32)]).reshape(1, Np)

    # TODO(synk): for very large D (Dp^2 * weight_bytes approaching ~half of
    # VMEM, e.g. D >= ~4096 f32 / ~5792 bf16) the resident W1 would need tiling
    # over the contraction dim; assumed to fit VMEM here.
    vmem_est = (2 * tb * ts * D * x_item                # x (double-buffered)
                + 2 * (D * D + D * Np) * w_item         # resident weights
                + 2 * tb * Np * 4                       # output
                + tb * D * 4                            # accumulator scratch
                + 2 * (D + Np) * 4)                     # biases
    # 56 MiB cap leaves headroom on v7x's 64 MiB VMEM; plenty for v5e/v6e too.
    vmem_limit = int(min(56 * 1024 * 1024,
                         max(32 * 1024 * 1024, vmem_est + 8 * 1024 * 1024)))

    kernel = functools.partial(_congosition_kernel,
                               inv_s=1.0 / S, seq_len=S, ts=ts)

    out = pl.pallas_call(
        kernel,
        out_shape=jax.ShapeDtypeStruct((B, Np), jnp.float32),
        grid_spec=pltpu.PrefetchScalarGridSpec(
            num_scalar_prefetch=0,
            grid=grid,
            in_specs=[
                pl.BlockSpec((tb, ts, D), lambda b, s: (b, s, 0)),   # x stream
                pl.BlockSpec((D, D), lambda b, s: (0, 0)),           # W1^T resident
                pl.BlockSpec((1, D), lambda b, s: (0, 0)),           # b1 resident
                pl.BlockSpec((D, Np), lambda b, s: (0, 0)),          # W2^T resident
                pl.BlockSpec((1, Np), lambda b, s: (0, 0)),          # b2 resident
            ],
            out_specs=pl.BlockSpec((tb, Np), lambda b, s: (b, 0)),
            scratch_shapes=[pltpu.VMEM((tb, D), jnp.float32)],
        ),
        compiler_params=pltpu.CompilerParams(
            dimension_semantics=("parallel", "arbitrary"),
            vmem_limit_bytes=vmem_limit,
        ),
    )(x, w1t, b1p, w2t, b2p)

    return out[:, :N]


def _reference(x, w1, b1, w2, b2):
    """Pure-JAX reference matching the PyTorch forward."""
    h = jnp.mean(x.astype(jnp.float32), axis=1)
    h = jnp.maximum(h @ w1.astype(jnp.float32).T + b1, 0.0)
    return jax.nn.softmax(h @ w2.astype(jnp.float32).T + b2, axis=-1)


def _kaiming_uniform(key, shape, a=math.sqrt(5)):
    # nn.init.kaiming_uniform_ with a=sqrt(5): bound = sqrt(6 / ((1+a^2)*fan_in))
    fan_in = shape[1]
    gain = math.sqrt(2.0 / (1.0 + a * a))
    bound = gain * math.sqrt(3.0 / fan_in)
    return jax.random.uniform(key, shape, jnp.float32, -bound, bound)


def _make_inputs(key, B, S, D, N):
    kx, kw1, kb1, kw2, kb2 = jax.random.split(key, 5)
    x = jax.random.normal(kx, (B, S, D), jnp.float32)
    w1 = _kaiming_uniform(kw1, (D, D))
    b1 = jax.random.uniform(kb1, (D,), jnp.float32,
                            -1.0 / math.sqrt(D), 1.0 / math.sqrt(D))
    w2 = _kaiming_uniform(kw2, (N, D))
    b2 = jax.random.uniform(kb2, (N,), jnp.float32,
                            -1.0 / math.sqrt(D), 1.0 / math.sqrt(D))
    return x, w1, b1, w2, b2


if __name__ == "__main__":
    key = jax.random.PRNGKey(0)
    k1, k2 = jax.random.split(key)

    # Test 1: evenly tiled shapes.  grid = (2, 4): exercises sequence
    # accumulation, epilogue gating and the resident-weight path.
    B, S, D, N = 16, 32, 32, 4
    x, w1, b1, w2, b2 = _make_inputs(k1, B, S, D, N)
    out = jax.block_until_ready(congosition_v1(x, w1, b1, w2, b2, tb=8, ts=8))
    ref = _reference(x, w1, b1, w2, b2)
    assert out.shape == (B, N)
    assert jnp.allclose(out, ref, atol=1e-5, rtol=1e-5), (out, ref)
    assert jnp.allclose(jnp.sum(out, axis=-1), 1.0, atol=1e-5)

    # Test 2: ragged shapes with NO wrapper-side padding of x -- partial last
    # batch tile (B=13 with tb=8), masked sequence tail (S=30 with ts=8), and
    # D not a multiple of 128 (full-array-dim block exception).
    B, S, D, N = 13, 30, 48, 5
    x, w1, b1, w2, b2 = _make_inputs(k2, B, S, D, N)
    out = jax.block_until_ready(congosition_v1(x, w1, b1, w2, b2, ts=8))
    ref = _reference(x, w1, b1, w2, b2)
    assert out.shape == (B, N)
    assert jnp.allclose(out, ref, atol=1e-5, rtol=1e-5), (out, ref)
    assert jnp.allclose(jnp.sum(out, axis=-1), 1.0, atol=1e-5)

    print("KERNEL_OK")
</pallas_src>

<mosaic_0001>
module attributes {stable_mosaic.version = 11 : i64} {
  func.func @_congosition_kernel(%arg0: i32, %arg1: i32, %arg2: memref<8x8x32xf32, #tpu.memory_space<vmem>>, %arg3: memref<32x32xf32, #tpu.memory_space<vmem>>, %arg4: memref<1x32xf32, #tpu.memory_space<vmem>>, %arg5: memref<32x128xf32, #tpu.memory_space<vmem>>, %arg6: memref<1x128xf32, #tpu.memory_space<vmem>>, %arg7: memref<8x128xf32, #tpu.memory_space<vmem>>, %arg8: memref<8x32xf32, #tpu.memory_space<vmem>>) attributes {dimension_semantics = [#tpu.dimension_semantics<parallel>, #tpu.dimension_semantics<arbitrary>], iteration_bounds = array<i64: 2, 4>, scalar_prefetch = 0 : i64, scratch_operands = 1 : i64, tpu.core_type = #tpu.core_type<tc>, window_params = [{transform_indices = @transform_0, window_bounds = array<i64: 8, 8, 32>}, {pipeline_mode = #tpu.pipeline_mode<synchronous>, transform_indices = @transform_1, window_bounds = array<i64: 32, 32>}, {pipeline_mode = #tpu.pipeline_mode<synchronous>, transform_indices = @transform_2, window_bounds = array<i64: 1, 32>}, {pipeline_mode = #tpu.pipeline_mode<synchronous>, transform_indices = @transform_3, window_bounds = array<i64: 32, 128>}, {pipeline_mode = #tpu.pipeline_mode<synchronous>, transform_indices = @transform_4, window_bounds = array<i64: 1, 128>}, {transform_indices = @transform_5, window_bounds = array<i64: 8, 128>}]} {
    %c0_i32 = arith.constant 0 : i32
    %0 = arith.cmpi eq, %arg1, %c0_i32 : i32
    %1 = arith.extui %0 : i1 to i32
    %c0_i32_0 = arith.constant 0 : i32
    %2 = arith.cmpi ne, %1, %c0_i32_0 : i32
    scf.if %2 {
      %cst_8 = arith.constant 0.000000e+00 : f32
      %11 = vector.broadcast %cst_8 : f32 to vector<8x32xf32>
      %c0_9 = arith.constant 0 : index
      %c0_10 = arith.constant 0 : index
      %12 = vector.load %arg8[%c0_9, %c0_10] : memref<8x32xf32, #tpu.memory_space<vmem>>, vector<8x32xf32>
      tpu.vector_store %arg8[%c0_9, %c0_10], %11 {strides = array<i32>} : memref<8x32xf32, #tpu.memory_space<vmem>>, vector<8x32xf32>,
    } else {
    }
    %c0 = arith.constant 0 : index
    %c0_1 = arith.constant 0 : index
    %c0_2 = arith.constant 0 : index
    %3 = vector.load %arg2[%c0, %c0_1, %c0_2] : memref<8x8x32xf32, #tpu.memory_space<vmem>>, vector<8x8x32xf32>
    %c0_3 = arith.constant 0 : index
    %c0_4 = arith.constant 0 : index
    %4 = vector.load %arg8[%c0_3, %c0_4] : memref<8x32xf32, #tpu.memory_space<vmem>>, vector<8x32xf32>
    %cst = arith.constant dense<0.000000e+00> : vector<8x32xf32>
    %5 = vector.multi_reduction <add>, %3, %cst [1] : vector<8x8x32xf32> to vector<8x32xf32>
    %6 = arith.addf %4, %5 : vector<8x32xf32>
    %c0_5 = arith.constant 0 : index
    %c0_6 = arith.constant 0 : index
    %7 = vector.load %arg8[%c0_5, %c0_6] : memref<8x32xf32, #tpu.memory_space<vmem>>, vector<8x32xf32>
    tpu.vector_store %arg8[%c0_5, %c0_6], %6 {strides = array<i32>} : memref<8x32xf32, #tpu.memory_space<vmem>>, vector<8x32xf32>,
    %c3_i32 = arith.constant 3 : i32
    %8 = arith.cmpi eq, %arg1, %c3_i32 : i32
    %9 = arith.extui %8 : i1 to i32
    %c0_i32_7 = arith.constant 0 : i32
    %10 = arith.cmpi ne, %9, %c0_i32_7 : i32
    scf.if %10 {
      %c0_8 = arith.constant 0 : index
      %c0_9 = arith.constant 0 : index
      %11 = vector.load %arg8[%c0_8, %c0_9] : memref<8x32xf32, #tpu.memory_space<vmem>>, vector<8x32xf32>
      %cst_10 = arith.constant 3.125000e-02 : f32
      %12 = vector.broadcast %cst_10 : f32 to vector<8x32xf32>
      %13 = arith.mulf %11, %12 : vector<8x32xf32>
      %c0_11 = arith.constant 0 : index
      %c0_12 = arith.constant 0 : index
      %14 = vector.load %arg3[%c0_11, %c0_12] : memref<32x32xf32, #tpu.memory_space<vmem>>, vector<32x32xf32>
      %cst_13 = arith.constant dense<0.000000e+00> : vector<8x32xf32>
      %15 = tpu.matmul %13, %14, %cst_13 {dimension_numbers = #tpu.dot_dimension_numbers<[1], [0], [0], [1], [0, 0, 1, 1], [], []>} : vector<8x32xf32>, vector<32x32xf32>, vector<8x32xf32> -> vector<8x32xf32>
      %c0_14 = arith.constant 0 : index
      %c0_15 = arith.constant 0 : index
      %16 = vector.load %arg4[%c0_14, %c0_15] : memref<1x32xf32, #tpu.memory_space<vmem>>, vector<1x32xf32>
      %17 = vector.broadcast %16 : vector<1x32xf32> to vector<8x32xf32>
      %18 = arith.addf %15, %17 : vector<8x32xf32>
      %cst_16 = arith.constant 0.000000e+00 : f32
      %19 = vector.broadcast %cst_16 : f32 to vector<8x32xf32>
      %20 = arith.maximumf %18, %19 : vector<8x32xf32>
      %c0_17 = arith.constant 0 : index
      %c0_18 = arith.constant 0 : index
      %21 = vector.load %arg5[%c0_17, %c0_18] : memref<32x128xf32, #tpu.memory_space<vmem>>, vector<32x128xf32>
      %cst_19 = arith.constant dense<0.000000e+00> : vector<8x128xf32>
      %22 = tpu.matmul %20, %21, %cst_19 {dimension_numbers = #tpu.dot_dimension_numbers<[1], [0], [0], [1], [0, 0, 1, 1], [], []>} : vector<8x32xf32>, vector<32x128xf32>, vector<8x128xf32> -> vector<8x128xf32>
      %c0_20 = arith.constant 0 : index
      %c0_21 = arith.constant 0 : index
      %23 = vector.load %arg6[%c0_20, %c0_21] : memref<1x128xf32, #tpu.memory_space<vmem>>, vector<1x128xf32>
      %24 = vector.broadcast %23 : vector<1x128xf32> to vector<8x128xf32>
      %25 = arith.addf %22, %24 : vector<8x128xf32>
      %cst_22 = arith.constant dense<0xFF800000> : vector<8xf32>
      %26 = vector.multi_reduction <maximumf>, %25, %cst_22 [1] : vector<8x128xf32> to vector<8xf32>
      %27 = vector.shape_cast %26 : vector<8xf32> to vector<8x1xf32>
      %28 = vector.broadcast %27 : vector<8x1xf32> to vector<8x128xf32>
      %29 = arith.subf %25, %28 : vector<8x128xf32>
      %30 = math.exp %29 : vector<8x128xf32>
      %cst_23 = arith.constant dense<0.000000e+00> : vector<8xf32>
      %31 = vector.multi_reduction <add>, %30, %cst_23 [1] : vector<8x128xf32> to vector<8xf32>
      %32 = vector.shape_cast %31 : vector<8xf32> to vector<8x1xf32>
      %33 = tpu.reciprocal %32 {approx = true} : vector<8x1xf32> -> vector<8x1xf32>
      %34 = arith.mulf %32, %33 : vector<8x1xf32>
      %cst_24 = arith.constant 2.000000e+00 : f32
      %35 = vector.broadcast %cst_24 : f32 to vector<8x1xf32>
      %36 = arith.subf %35, %34 : vector<8x1xf32>
      %37 = arith.mulf %33, %36 : vector<8x1xf32>
      %38 = vector.broadcast %37 : vector<8x1xf32> to vector<8x128xf32>
      %39 = arith.mulf %30, %38 : vector<8x128xf32>
      %c0_25 = arith.constant 0 : index
      %c0_26 = arith.constant 0 : index
      %40 = vector.load %arg7[%c0_25, %c0_26] : memref<8x128xf32, #tpu.memory_space<vmem>>, vector<8x128xf32>
      tpu.vector_store %arg7[%c0_25, %c0_26], %39 {strides = array<i32>} : memref<8x128xf32, #tpu.memory_space<vmem>>, vector<8x128xf32>,
    } else {
    }
    return
  }
  func.func @transform_0(%arg0: i32, %arg1: i32) -> (i32, i32, i32) {
    %c0_i32 = arith.constant 0 : i32
    %c0_i32_0 = arith.constant 0 : i32
    return %arg0, %arg1, %c0_i32 : i32, i32, i32
  }
  func.func @transform_1(%arg0: i32, %arg1: i32) -> (i32, i32) {
    %c0_i32 = arith.constant 0 : i32
    %c0_i32_0 = arith.constant 0 : i32
    %c0_i32_1 = arith.constant 0 : i32
    return %c0_i32, %c0_i32_0 : i32, i32
  }
  func.func @transform_2(%arg0: i32, %arg1: i32) -> (i32, i32) {
    %c0_i32 = arith.constant 0 : i32
    %c0_i32_0 = arith.constant 0 : i32
    %c0_i32_1 = arith.constant 0 : i32
    return %c0_i32, %c0_i32_0 : i32, i32
  }
  func.func @transform_3(%arg0: i32, %arg1: i32) -> (i32, i32) {
    %c0_i32 = arith.constant 0 : i32
    %c0_i32_0 = arith.constant 0 : i32
    %c0_i32_1 = arith.constant 0 : i32
    return %c0_i32, %c0_i32_0 : i32, i32
  }
  func.func @transform_4(%arg0: i32, %arg1: i32) -> (i32, i32) {
    %c0_i32 = arith.constant 0 : i32
    %c0_i32_0 = arith.constant 0 : i32
    %c0_i32_1 = arith.constant 0 : i32
    return %c0_i32, %c0_i32_0 : i32, i32
  }
  func.func @transform_5(%arg0: i32, %arg1: i32) -> (i32, i32) {
    %c0_i32 = arith.constant 0 : i32
    %c0_i32_0 = arith.constant 0 : i32
    return %arg0, %c0_i32 : i32, i32
  }
}

</mosaic_0001>

<bundles_post_ra>
// kernel: tpu_custom_call.1
= control target key start
LH: loop header
LB: loop body
LE: loop exit
PB: predicated region body
PF: predicated region fallthrough
CT: control target
= control target key end

     0   :  { %s1484_s0 = inlined_call_operand.hbm [shape: f32[16,32,32], index: 0, kind: input, shape index: {}]   ;;  %s1485_s1 = inlined_call_operand.hbm [shape: f32[32,32], index: 1, kind: input, shape index: {}]   ;;  %s1486_s2 = inlined_call_operand.vmem [shape: f32[1,32], index: 2, kind: input, shape index: {}]   ;;  %s1487_s3 = inlined_call_operand.hbm [shape: f32[32,128], index: 3, kind: input, shape index: {}]   ;;  %s1488_s4 = inlined_call_operand.vmem [shape: f32[1,128], index: 4, kind: input, shape index: {}]   ;;  %s1489_s5 = inlined_call_operand.hbm [shape: f32[16,128], index: 5, kind: output, shape index: {}]  }
   0x1   :  { %1503 = sst [smem:[#allocation17_spill]] %s1485_s1 }
   0x2   :  { %1504 = sst [smem:[#allocation18_spill]] %s1487_s3 }
   0x3   :  { %1505 = sst [smem:[#allocation19_spill]] %s1489_s5 }
   0x4   :  { %10 = vsyncpa [#allocation4], 0 }
   0x5   :  { %12 = vsyncpa [#allocation4 + $0x1], 0 }
   0x6   :  { %13 = vsyncpa [#allocation7], 0 }
   0x7   :  { %14 = vsyncpa [#allocation5], 0 }
   0x8   :  { %16 = vsyncpa [#allocation5 + $0x1], 0  ;;  %s1149_s18 = smov 0   ;;  %s1151_s19 = smov 0  }
   0x9   :  { %s1153_s20 = smov 0   ;;  %s1155_s21 = smov 0  }
   0xa   :  { %s1157_s22 = smov 0   ;;  %s1159_s23 = smov 0  }
   0xb   :  { %s1161_s24 = smov 0   ;;  %s1163_s25 = smov 0  }
   0xc   :  { %s1165_s26 = smov 0   ;;  %s1167_s27 = smov 0  }
   0xd   :  { %s1169_s28 = smov 0  }
   0xe LB: > { %1506 = sst [smem:[#allocation13_spill]] %s1066_s18  ;;  %s690_s29 = sadd.s32 4294967295, %s1106_s28   ;;  %s1106_s28 = sphi %s1169_s28, %s22_s28   ;;  %s1102_s27 = sphi %s1167_s27, %s1542_s27   ;;  %s1098_s26 = sphi %s1165_s26, %s1541_s26   ;;  %s1094_s25 = sphi %s1163_s25, %s1540_s25   ;;  %s1090_s24 = sphi %s1161_s24, %s1539_s24   ;;  %s1086_s23 = sphi %s1159_s23, %s1538_s23   ;;  %s1082_s22 = sphi %s1157_s22, %s1537_s22   ;;  %s1078_s21 = sphi %s1155_s21, %s1536_s21   ;;  %s1074_s20 = sphi %s1153_s20, %s1535_s20   ;;  %s1070_s19 = sphi %s1151_s19, %s1534_s19   ;;  %s1066_s18 = sphi %s1149_s18, %s1533_s18  }
   0xf   : > { %1507 = sst [smem:[#allocation14_spill]] %s1106_s28  ;;  %s691_s30 = sadd.s32 4294967294, %s1106_s28  }
  0x10   : > { %p50_p0 = scmp.ne.s32.totalorder %s1086_s23, %s1082_s22  ;;  %p51_p1 = scmp.eq.s32.totalorder %s1106_s28, 0 }
  0x11   : > { %p56_p2 = scmp.ne.s32.totalorder %s1082_s22, %s1078_s21  ;;  %p1209_p3 = scmp.eq.s32.totalorder %s690_s29, 0 }
  0x12   : > { %p1214_p4 = por %p51_p1, %p50_p0  ;;  %p163_p5 = scmp.ne.s32.totalorder %s1074_s20, %s1070_s19 }
  0x13   : > { %s1508_s7 = scalar_select %p1209_p3, 1, 0 }
  0x14   : > { %p1222_p6 = por %p1209_p3, %p56_p2  ;;  %p164_p7 = scmp.eq.s32.totalorder %s690_s29, 7 }
  0x15   : > { %p169_p8 = scmp.ne.s32.totalorder %s1070_s19, %s1066_s18  ;;  %p170_p9 = scmp.eq.s32.totalorder %s691_s30, 7 }
  0x16   : > { %s1510_s10 = scalar_select %p1222_p6, 1, 0 }
  0x17   : > { %p1228_p10 = por %p164_p7, %p163_p5  ;;  %p692_p11 = scmp.ge.s32.totalorder %s1106_s28, 1 }
  0x18   : > { %p1233_p12 = por %p170_p9, %p169_p8  ;;  %p177_p13 = scmp.lt.s32.totalorder %s1106_s28, 9 }
  0x19   : > { %s1511_s11 = scalar_select %p1228_p10, 1, 0 }
  0x1a   : > { %s1513_s12 = scalar_select %p1233_p12, 1, 0 }
  0x1b   : > { %1512 = sst [smem:[#allocation15_spill]] %s1511_s11  ;;  %p1238_p0 = pnand %p692_p11, %p177_p13 }
  0x1c   : > { %1514 = sst [smem:[#allocation16_spill]] %s1513_s12  ;;  %s1108_s14 = smov [#allocation6]  }
  0x1d   : > { %s189_s15 = sshll.u32 %s1108_s14, 4  ;;  %p772_p1 = pneg %p1238_p0  ;;  %s1242_s15 = int_to_ptr.vmem [resolvable:$true] %s189_s15 }
  0x1e   : > { %p789_p2 = scmp.lt.s32.totalorder %s1106_s28, 8  ;;  %s1109_s21 = smov [#allocation8]  }
  0x1f   : > { %p1249_p5 = pnand %p772_p1, %p1209_p3  ;;  %s205_s29 = sshll.u32 %s1109_s21, 4  ;;  %s1259_s29 = int_to_ptr.vmem [resolvable:$true] %s205_s29 }
  0x20   : > { %p1255_p7 = pnand %p789_p2, %p1214_p4  ;;  %s1518_s1 = sld [smem:[#allocation17_spill]] }
  0x21   : > { %p896_p9 = pneg %p1249_p5 }
  0x26   : > { %s894_s6 = scalar_lea.hbm %s1518_s1, 512 }
  0x27   : > { %p895_p8 = scmp.ne.s32.totalorder %s1518_s1, %s894_s6  ;;  %p901_p13 = scmp.lt.u32.totalorder %s894_s6, %s1518_s1 }
  0x29   : > { %p897_p4 = pnand %p896_p9, %p895_p8 }
  0x2b   : > { %p898_p11 = pneg %p897_p4 }
  0x2d   : > { %p903_p1 = pnand %p901_p13, %p898_p11 }
  0x2f   : > { %906 = shalt.err (!%p903_p1)
}
  0x30   : > { %s907_s21 = scalar_lea.vmem %s1242_s15, 512  ;;  %p915_p3 = scmp.lt.s32.totalorder %s1242_s15, %s1242_s15 }
  0x31   : > { %p908_p2 = scmp.ne.s32.totalorder %s1242_s15, %s907_s21  ;;  %p916_p8 = scmp.lt.s32.totalorder %s907_s21, %s907_s21 }
  0x33   : > { %p910_p12 = pnand %p908_p2, %p896_p9  ;;  %p917_p4 = por %p916_p8, %p915_p3 }
  0x35   : > { %p911_p10 = pneg %p910_p12 }
  0x37   : > { %p918_p6 = pnand %p917_p4, %p911_p10 }
  0x39   : > { %921 = shalt.err (!%p918_p6)
}
  0x3a   : > { %s1501_s18 = smov 128   ;;  %s1502_s6 = smov 8  }
  0x3b   : > { %775 = dma.hbm_to_vmem [thread:$0]  (!%p1249_p5), %s1518_s1, 512, %s1242_s15, [#allocation7], %s1501_s18, %s1501_s18, %s1502_s6  }
  0x3c   : > { %s1519_s3 = sld [smem:[#allocation18_spill]] }
  0x42   : > { %s922_s9 = scalar_lea.hbm %s1519_s3, 512 }
  0x43   : > { %p923_p3 = scmp.ne.s32.totalorder %s1519_s3, %s922_s9  ;;  %p929_p12 = scmp.lt.u32.totalorder %s922_s9, %s1519_s3 }
  0x45   : > { %p925_p6 = pnand %p923_p3, %p896_p9 }
  0x47   : > { %p926_p10 = pneg %p925_p6 }
  0x49   : > { %p931_p11 = pnand %p929_p12, %p926_p10 }
  0x4b   : > { %934 = shalt.err (!%p931_p11)
}
  0x4c   : > { %s935_s15 = scalar_lea.vmem %s1259_s29, 512  ;;  %p943_p8 = scmp.lt.s32.totalorder %s1259_s29, %s1259_s29 }
  0x4d   : > { %p936_p13 = scmp.ne.s32.totalorder %s1259_s29, %s935_s15  ;;  %p944_p4 = scmp.lt.s32.totalorder %s935_s15, %s935_s15 }
  0x4f   : > { %p938_p1 = pnand %p936_p13, %p896_p9  ;;  %p945_p3 = por %p944_p4, %p943_p8 }
  0x51   : > { %p939_p2 = pneg %p938_p1 }
  0x53   : > { %p946_p6 = pnand %p945_p3, %p939_p2 }
  0x55   : > { %949 = shalt.err (!%p946_p6)
}
  0x56   : > { %778 = dma.hbm_to_vmem [thread:$0]  (!%p1249_p5), %s1519_s3, 512, %s1259_s29, [#allocation7], %s1501_s18, %s1501_s18, %s1502_s6  }
  0x57   : > { %s31_s11 = sadd.s32 1, %s1098_s26  ;;  %s34_s8 = sadd.s32 1, %s1102_s27 }
  0x58   : > { %p32_p9 = scmp.ge.s32.totalorder %s31_s11, 4  ;;  %s222_s16 = sand.u32 1, %s1086_s23  }
  0x59   : > { %s715_s12 = sshll.u32 %s1102_s27, 5  ;;  %s696_s14 = sshll.u32 %s222_s16, 6 }
  0x5a   : > { %s1544_s11 = smov (%p32_p9, %s31_s11), 0  ;;  %s1546_s8 = smov (!%p32_p9, %s34_s8), %s1102_s27 }
  0x5b   : > { %s39_s30 = ssub.s32 %s1098_s26, %s1544_s11  ;;  %p36_p10 = scmp.ge.s32.totalorder %s1546_s8, 2 }
  0x5c   : > { %s232_s9 = sadd.s32 %s1098_s26, %s715_s12  ;;  %s226_s21 = scalar_lea.vmem [#allocation3], %s696_s14 }
  0x5d   : > { %s1548_s8 = smov (%p36_p10, %s1546_s8), 0  ;;  %s699_s29 = sshll.u32 %s232_s9, 7 }
  0x5e   : > { %s235_s15 = sshll.u32 %s226_s21, 4  ;;  %s38_s5 = ssub.s32 %s1102_s27, %s1548_s8  ;;  %s1338_s15 = int_to_ptr.vmem [resolvable:$true] %s235_s15 }
  0x5f   : > { %s1336_s6 = scalar_lea.hbm %s1484_s0, %s699_s29  ;;  %s40_s1 = sor.u32 %s39_s30, %s38_s5 }
  0x60   : > { %p151_p5 = scmp.eq.s32.totalorder %s38_s5, 0  ;;  %p41_p12 = scmp.eq.s32.totalorder %s40_s1, 0 }
  0x61   : > { %s1520_s12 = sadd.s32 1, %s1074_s20  ;;  %s1521_s14 = sadd.s32 1, %s1086_s23 }
  0x62   : > { %s1343_s3 = scalar_select %p151_p5, %s1074_s20, %s1520_s12  }
  0x63   : > { %s1348_s9 = scalar_select %p41_p12, %s1086_s23, %s1521_s14  }
  0x64   : > { %s1350_s21 = scalar_lea.sflag [#allocation4], %s222_s16  ;;  %s950_s18 = scalar_lea.hbm %s1336_s6, 1024 }
  0x65   : > { %p951_p11 = scmp.ne.s32.totalorder %s1336_s6, %s950_s18  ;;  %p952_p13 = pneg %p1255_p7 }
  0x66   : > { %s955_s29 = scalar_lea.hbm %s1484_s0, 8192  ;;  %p956_p8 = scmp.lt.u32.totalorder %s1336_s6, %s1484_s0 }
  0x67   : > { %p953_p1 = pnand %p952_p13, %p951_p11  ;;  %p957_p4 = scmp.lt.u32.totalorder %s955_s29, %s950_s18 }
  0x68   : > { %p959_p6 = scmp.lt.u32.totalorder %s950_s18, %s1336_s6 }
  0x69   : > { %p954_p2 = pneg %p953_p1  ;;  %p958_p3 = por %p957_p4, %p956_p8 }
  0x6b   : > { %p960_p9 = por %p959_p6, %p958_p3 }
  0x6d   : > { %p961_p10 = pnand %p960_p9, %p954_p2 }
  0x6f   : > { %964 = shalt.err (!%p961_p10)
}
  0x70   : > { %s965_s16 = scalar_lea.vmem %s1338_s15, 1024  ;;  %s1112_s12 = smov [#allocation3]  }
  0x71   : > { %p966_p5 = scmp.ne.s32.totalorder %s1338_s15, %s965_s16  ;;  %s970_s14 = sshll.u32 %s1112_s12, 4  ;;  %s971_s14 = int_to_ptr.vmem [resolvable:$false] %s970_s14 }
  0x72   : > { %s972_s30 = scalar_lea.vmem %s971_s14, 2048  ;;  %p973_p1 = scmp.lt.s32.totalorder %s1338_s15, %s971_s14 }
  0x73   : > { %p968_p12 = pnand %p966_p5, %p952_p13  ;;  %p974_p8 = scmp.lt.s32.totalorder %s972_s30, %s965_s16 }
  0x75   : > { %p969_p11 = pneg %p968_p12  ;;  %p975_p4 = por %p974_p8, %p973_p1 }
  0x77   : > { %p976_p3 = pnand %p975_p4, %p969_p11 }
  0x79   : > { %979 = shalt.err (!%p976_p3)
}
  0x7a   : > { %s1113_s18 = smov 512   ;;  %s1522_s1 = smov 8  }
  0x7b   : > { %s1523_s29 = smov 128   ;;  %247 = sbr.rel (%p1238_p0) target bundleno = 952 (0x3b8), region = 40 }
  0x7c   : > { %782 = dma.hbm_to_vmem [thread:$0]  (!%p1255_p7), %s1336_s6, 1024, %s1338_s15, %s1350_s21, %s1113_s18, %s1523_s29, %s1522_s1  }
  0x7d   : > { %s249_s5 = sand.u32 (!%p1238_p0), 1, %s1082_s22   ;;  %p1524_p13 = scmp.ne.s32.totalorder (!%p1238_p0), %s1510_s10, 0 }
  0x7e   : > { %s701_s28 = sshll.u32 (!%p1238_p0), %s249_s5, 6  ;;  %s250_s16 = scalar_lea.sflag (!%p1238_p0), [#allocation4], %s249_s5 }
  0x7f   : > { %s253_s12 = scalar_lea.vmem (!%p1238_p0), [#allocation3], %s701_s28 }
  0x82   : > { %1053 = dma.done.wait (%p1524_p13), %s250_s16, 1024  }
  0x83   : > { %1055 = vsyncadd (%p1524_p13), %s250_s16, 4294966272  ;;  %p1525_p2 = scmp.ne.s32.totalorder %s1508_s7, 0 }
  0x85   : > { %1057 = dma.done.wait (%p1525_p2), [#allocation7], 1024  }
  0x86   : > { %1059 = vsyncadd (%p1525_p2), [#allocation7], 4294966272  ;;  %s285_s13 = sand.u32 1, %s1070_s19   ;;  %p705_p0 = scmp.ne.s32.totalorder %s1090_s24, 0 }
  0x87   : > { %s1394_s17 = sshll.u32 %s285_s13, 3  ;;  %vm293_vm0 = vcmask (!%p705_p0), 261120   ;;  %v1114_v0 = vmov (!%p705_p0), 0.0  }
  0x88   : > { %s287_s6 = scalar_lea.vmem [#allocation9], %s1394_s17  ;;  %292 = sbr.rel (%p705_p0) target bundleno = 143 (0x8f), region = 56  ;;  %294 = vst.msk [vmem:[#allocation2] sm:$0xff] (!%p705_p0), %vm293_vm0, %v1114_v0 }
  0x8f PF: > { %v295_v1 = vld [vmem:[%s253_s12] sm:$0xff]  ;;  %v296_v2 = vld [vmem:[%s253_s12 + $0x8] sm:$0xff]  ;;  %v297_v3 = vld [vmem:[%s253_s12 + $0x10] sm:$0xff]  ;;  %vm304_vm1 = vcmask 261120   ;;  %vm369_vm2 = vcmask 1041409   ;;  %vm371_vm3 = vcmask 1042434  }
  0x90   : > { %v298_v4 = vld [vmem:[%s253_s12 + $0x18] sm:$0xff]  ;;  %v299_v5 = vld [vmem:[%s253_s12 + $0x20] sm:$0xff]  ;;  %v300_v6 = vld [vmem:[%s253_s12 + $0x28] sm:$0xff]  ;;  %v305_v7 = vsel %vm304_vm1, %v295_v1, 0.0  ;;  %v312_v8 = vsel %vm304_vm1, %v296_v2, 0.0  ;;  %v319_v9 = vsel %vm304_vm1, %v297_v3, 0.0 }
  0x91   : > { %v301_v10 = vld [vmem:[%s253_s12 + $0x30] sm:$0xff]  ;;  %v302_v11 = vld [vmem:[%s253_s12 + $0x38] sm:$0xff]  ;;  %v306_v12 = vrot.slane %v305_v7, 4  ;;  %v313_v13 = vrot.slane %v312_v8, 4  ;;  %v320_v14 = vrot.slane %v319_v9, 4  ;;  %v326_v15 = vsel %vm304_vm1, %v298_v4, 0.0 }
  0x92   : > { %v333_v16 = vsel %vm304_vm1, %v299_v5, 0.0  ;;  %v340_v17 = vsel %vm304_vm1, %v300_v6, 0.0  ;;  %v347_v18 = vsel %vm304_vm1, %v301_v10, 0.0  ;;  %v327_v22 = vrot.slane %v326_v15, 4  ;;  %v303_v5 = vld [vmem:[#allocation2] sm:$0xff]  ;;  %p706_p7 = scmp.ne.s32.totalorder %s1090_s24, 3 }
  0x93   : > { %v307_v19 = vadd.f32 %v306_v12, %v305_v7  ;;  %v314_v20 = vadd.f32 %v313_v13, %v312_v8  ;;  %v321_v21 = vadd.f32 %v320_v14, %v319_v9  ;;  %v334_v23 = vrot.slane %v333_v16, 4  ;;  %v392_v10 = vld [vmem:[#allocation6] sm:$0xff] (!%p706_p7)  ;;  %v394_v12 = vld [vmem:[#allocation6 + $0x10] sm:$0xff] (!%p706_p7) }
  0x94   : > { %v341_v24 = vrot.slane %v340_v17, 4  ;;  %v348_v25 = vrot.slane %v347_v18, 4  ;;  %v354_v26 = vsel %vm304_vm1, %v302_v11, 0.0  ;;  %v328_v30 = vadd.f32 %v327_v22, %v326_v15  ;;  %v393_v11 = vld [vmem:[#allocation6 + $0x8] sm:$0xff] (!%p706_p7)  ;;  %v395_v15 = vld [vmem:[#allocation6 + $0x18] sm:$0xff] (!%p706_p7) }
  0x95   : > { %v308_v27 = vrot.slane %v307_v19, 2  ;;  %v315_v28 = vrot.slane %v314_v20, 2  ;;  %v322_v29 = vrot.slane %v321_v21, 2  ;;  %v335_v31 = vadd.f32 %v334_v23, %v333_v16  ;;  %v479_v23 = vld [vmem:[#allocation8 + $0x10] sm:$0xff] (!%p706_p7) }
  0x96   : > { %v342_v32 = vadd.f32 %v341_v24, %v340_v17  ;;  %v349_v33 = vadd.f32 %v348_v25, %v347_v18  ;;  %v355_v34 = vrot.slane %v354_v26, 4  ;;  %v329_v38 = vrot.slane %v328_v30, 2  ;;  %v477_v17 = vld [vmem:[#allocation8] sm:$0xff] (!%p706_p7)  ;;  %v478_v18 = vld [vmem:[#allocation8 + $0x8] sm:$0xff] (!%p706_p7)  ;;  %v480_v24 = vld [vmem:[#allocation8 + $0x18] sm:$0xff] (!%p706_p7) }
  0x97   : > { %v309_v35 = vadd.f32 %v308_v27, %v307_v19  ;;  %v316_v36 = vadd.f32 %v315_v28, %v314_v20  ;;  %v323_v37 = vadd.f32 %v322_v29, %v321_v21  ;;  %v336_v39 = vrot.slane %v335_v31, 2 }
  0x98   : > { %v343_v40 = vrot.slane %v342_v32, 2  ;;  %v350_v41 = vrot.slane %v349_v33, 2  ;;  %v356_v42 = vadd.f32 %v355_v34, %v354_v26  ;;  %v330_v46 = vadd.f32 %v329_v38, %v328_v30  ;;  %v707_v26 = vld [vmem:[%s1486_s2] ss:$0 sm:$0xff] (!%p706_p7) }
  0x99   : > { %v310_v43 = vrot.slane %v309_v35, 1  ;;  %v317_v44 = vrot.slane %v316_v36, 1  ;;  %v324_v45 = vrot.slane %v323_v37, 1  ;;  %v337_v47 = vadd.f32 %v336_v39, %v335_v31  ;;  %v709_v31 = vld [vmem:[%s1488_s4] ss:$0 sm:$0xff] (!%p706_p7) }
  0x9a   : > { %v344_v48 = vadd.f32 %v343_v40, %v342_v32  ;;  %v351_v49 = vadd.f32 %v350_v41, %v349_v33  ;;  %v357_v50 = vrot.slane %v356_v42, 2  ;;  %v331_v54 = vrot.slane %v330_v46, 1 }
  0x9b   : > { %v311_v51 = vadd.f32 %v310_v43, %v309_v35  ;;  %v318_v52 = vadd.f32 %v317_v44, %v316_v36  ;;  %v325_v53 = vadd.f32 %v324_v45, %v323_v37  ;;  %v338_v55 = vrot.slane %v337_v47, 1 }
  0x9c   : > { %v345_v56 = vrot.slane %v344_v48, 1  ;;  %v352_v57 = vrot.slane %v351_v49, 1  ;;  %v358_v58 = vadd.f32 %v357_v50, %v356_v42  ;;  %v332_v59 = vadd.f32 %v331_v54, %v330_v46 }
  0x9d   : > { %v370_v60 = vsel %vm369_vm2, %v318_v52, %v311_v51  ;;  %vm373_vm4 = vcmask 1043459   ;;  %v339_v61 = vadd.f32 %v338_v55, %v337_v47  ;;  %vm375_vm5 = vcmask 1044484  }
  0x9e   : > { %v346_v62 = vadd.f32 %v345_v56, %v344_v48  ;;  %v359_v63 = vrot.slane %v358_v58, 1  ;;  %v353_v0 = vadd.f32 %v352_v57, %v351_v49  ;;  %v372_v1 = vsel %vm371_vm3, %v325_v53, %v370_v60 }
  0x9f   : > { %vm377_vm6 = vcmask 1045509   ;;  %v374_v3 = vsel %vm373_vm4, %v332_v59, %v372_v1  ;;  %vm379_vm7 = vcmask 1046534   ;;  %vm381_vm8 = vcmask 1047559  }
  0xa0   : > { %v360_v2 = vadd.f32 %v359_v63, %v358_v58  ;;  %v376_v4 = vsel %vm375_vm5, %v339_v61, %v374_v3  ;;  %389 = sbr.rel (%p706_p7) target bundleno = 925 (0x39d), region = 60  ;;  %v1115_v13 = vmov (!%p706_p7), 0.0|0.0   ;;  %v749_v14 = vpack.c.bf16 (!%p706_p7), %v393_v11, %v392_v10 }
  0xa1   : > { %v378_v6 = vsel %vm377_vm6, %v346_v62, %v376_v4  ;;  %748 = vmatprep.subr.bf16.mxu0 (!%p706_p7), %v1115_v13  ;;  %vm1116_vm9 = vmmov (!%p706_p7), 0   ;;  %v1117_v16 = vmov (!%p706_p7), 0.0   ;;  %754 = vmatprep.subr.bf16.mxu1 (!%p706_p7), %v1115_v13  ;;  %v752_v19 = vpack.c.bf16 (!%p706_p7), %v395_v15, %v394_v12 }
  0xa2   : > { %v380_v7 = vsel %vm379_vm7, %v353_v0, %v378_v6  ;;  %734 = vmatprep.mubr.msk.f32.mxu0 (!%p706_p7), %vm1116_vm9, %v1117_v16  ;;  %745 = vmatprep.mubr.msk.f32.mxu1 (!%p706_p7), %vm1116_vm9, %v1117_v16  ;;  %v755_v21 = vpack.c.bf16 (!%p706_p7), %v478_v18, %v477_v17  ;;  %v758_v25 = vpack.c.bf16 (!%p706_p7), %v480_v24, %v479_v23 }
  0xa3   : > { %v382_v8 = vsel %vm381_vm8, %v360_v2, %v380_v7  ;;  %750 = vmatpush3.bf16.msra.mxu0 (!%p706_p7), %v749_v14 }
  0xa4   : > { %v384_v9 = vadd.f32 %v382_v8, %v303_v5  ;;  %751 = vmatprep.subr.bf16.mxu0 (!%p706_p7), %v1115_v13  ;;  %756 = vmatpush3.bf16.msra.mxu1 (!%p706_p7), %v755_v21 }
  0xa5   : > { %757 = vmatprep.subr.bf16.mxu1 (!%p706_p7), %v1115_v13 }
  0xa6   : > { %385 = vst.msk [vmem:[#allocation2] sm:$0xff] %vm304_vm1, %v384_v9 }
  0xa7   : > { %753 = vmatpush3.bf16.msra.mxu0 %v752_v19 }
  0xa8   : > { %759 = vmatpush3.bf16.msra.mxu1 %v758_v25 }
  0xad   : > { %v390_v20 = vld [vmem:[#allocation2] sm:$0xff] }
  0xae   : > { %v391_v22 = vmul.f32 0.03125, %v390_v20 }
  0xb0   : > { %735 = vmatmul.mubr.msk.f32.vlgmr.msra.gmra.mrb[0].mxu0 %vm304_vm1, %v391_v22 }
 0x183   : > { %v472_v27 = vpop.f32.mrb[0].mxu0 }
 0x184   : > { %v473_v28 = vadd.f32 %v707_v26, %v472_v27  ;;  %v736_v29 = vpop.f32.mrb[1].mxu0 }
 0x186   : > { %v476_v30 = vmax.f32 %v473_v28, 0.0 }
 0x188   : > { %746 = vmatmul.mubr.msk.f32.vlgmr.msra.gmra.mrb[0].mxu1 %vm304_vm1, %v476_v30 }
 0x25b   : > { %v557_v32 = vpop.f32.mrb[0].mxu1 }
 0x25c   : > { %v558_v33 = vadd.f32 %v709_v31, %v557_v32  ;;  %v747_v34 = vpop.f32.mrb[1].mxu1 }
 0x25e   : > { %561 = vmax.xlane.f32.xlu0 %v558_v33 }
 0x2eb   : > { %v562_v35 = vpop.xlane.xlu0 %561 }
 0x2ec   : > { %v563_v36 = vsub.f32 %v558_v33, %v562_v35 }
 0x2ee   : > { %v564_v37 = vmul.f32 1.442695, %v563_v36 }
 0x2f0   : > { %890 = vpow2.f32 %v564_v37 }
 0x2fa   : > { %v891_v38 = vpop.eup %890 }
 0x2fb   : > { %566 = vadd.xlane.f32.xlu0 %v891_v38 }
 0x388   : > { %v567_v39 = vpop.xlane.xlu0 %566 }
 0x389   : > { %892 = vrcp.f32 %v567_v39 }
 0x393   : > { %v893_v40 = vpop.eup %892 }
 0x394   : > { %v569_v41 = vmul.f32 %v893_v40, %v567_v39 }
 0x396   : > { %v570_v42 = vsub.f32 2.0, %v569_v41 }
 0x398   : > { %v571_v43 = vmul.f32 %v893_v40, %v570_v42 }
 0x39a   : > { %v572_v44 = vmul.f32 %v891_v38, %v571_v43 }
 0x39c   : > { %573 = vst [vmem:[%s287_s6] sm:$0xff] %v572_v44 }
 0x39d PF: > { %s1526_s21 = sld [smem:[#allocation15_spill]]  ;;  %s712_s14 = sshll.u32 %s1094_s25, 7 }
 0x39e   : > { %s1527_s1 = sld [smem:[#allocation19_spill]]  ;;  %s588_s5 = sshll.u32 %s287_s6, 4  ;;  %s589_s5 = int_to_ptr.vmem [resolvable:$true] %s588_s5 }
 0x39f   : > { %s575_s28 = scalar_lea.sflag [#allocation5], %s285_s13  ;;  %s980_s16 = scalar_lea.vmem %s589_s5, 128 }
 0x3a0   : > { %p981_p6 = scmp.ne.s32.totalorder %s589_s5, %s980_s16  ;;  %s1118_s12 = smov [#allocation9]  }
 0x3a1   : > { %s984_s24 = sshll.u32 %s1118_s12, 4  ;;  %s985_s24 = int_to_ptr.vmem [resolvable:$false] %s984_s24 }
 0x3a2   : > { %s986_s7 = scalar_lea.vmem %s985_s24, 256  ;;  %p987_p12 = scmp.lt.s32.totalorder %s589_s5, %s985_s24 }
 0x3a3   : > { %p1528_p9 = scmp.ne.s32.totalorder %s1526_s21, 0  ;;  %p988_p11 = scmp.lt.s32.totalorder %s986_s7, %s980_s16 }
 0x3a4   : > { %s1424_s29 = scalar_lea.hbm %s1527_s1, %s712_s14 }
 0x3a5   : > { %p982_p10 = pnand %p981_p6, %p1528_p9  ;;  %p989_p1 = por %p988_p11, %p987_p12 }
 0x3a7   : > { %p983_p5 = pneg %p982_p10 }
 0x3a9   : > { %p990_p8 = pnand %p989_p1, %p983_p5 }
 0x3ab   : > { %993 = shalt.err (!%p990_p8)
}
 0x3ac   : > { %s994_s25 = scalar_lea.hbm %s1424_s29, 128  ;;  %s998_s6 = scalar_lea.hbm %s1527_s1, 256 }
 0x3ad   : > { %p995_p4 = scmp.ne.s32.totalorder %s1424_s29, %s994_s25  ;;  %p999_p2 = scmp.lt.u32.totalorder %s1424_s29, %s1527_s1 }
 0x3ae   : > { %p1000_p0 = scmp.lt.u32.totalorder %s998_s6, %s994_s25  ;;  %p1002_p6 = scmp.lt.u32.totalorder %s994_s25, %s1424_s29 }
 0x3af   : > { %p996_p3 = pnand %p995_p4, %p1528_p9 }
 0x3b0   : > { %p1001_p7 = por %p1000_p0, %p999_p2 }
 0x3b1   : > { %p997_p13 = pneg %p996_p3 }
 0x3b2   : > { %p1003_p10 = por %p1002_p6, %p1001_p7 }
 0x3b4   : > { %p1004_p5 = pnand %p1003_p10, %p997_p13 }
 0x3b6   : > { %1007 = shalt.err (!%p1004_p5)
}
 0x3b7   : > { %770 = dma.vmem_to_hbm [thread:$0]  (%p1528_p9), %s589_s5, 128, %s1424_s29, %s575_s28  }
 0x3b8 PF: > { %s1529_s14 = sld [smem:[#allocation14_spill]]  ;;  %s1530_s30 = sld [smem:[#allocation13_spill]] }
 0x3b9   : > { %s1531_s18 = sld [smem:[#allocation16_spill]] }
 0x3be   : > { %p792_p12 = scmp.ge.s32.totalorder %s1529_s14, 2  ;;  %s600_s16 = sand.u32 1, %s1530_s30  }
 0x3bf   : > { %p1532_p11 = scmp.ne.s32.totalorder %s1531_s18, 0  ;;  %s601_s12 = scalar_lea.sflag [#allocation5], %s600_s16 }
 0x3c1   : > { %p784_p1 = pnand %p792_p12, %p1532_p11 }
 0x3c3   : > { %1061 = dma.done.wait (!%p784_p1), %s601_s12, 128  }
 0x3c4   : > { %1063 = vsyncadd (!%p784_p1), %s601_s12, 4294967168  ;;  %s22_s28 = sadd.s32 1, %s1529_s14   ;;  %s1533_s18 = smov %s1070_s19 }
 0x3c5   : > { %p19_p8 = scmp.ge.s32.totalorder %s22_s28, 10   ;;  %s1534_s19 = smov %s1074_s20 }
 0x3c6   : > { %s1535_s20 = smov %s1343_s3  ;;  %s1536_s21 = smov %s1082_s22 }
 0x3c7   : > { %s1537_s22 = smov %s1086_s23  ;;  %s1538_s23 = smov %s1348_s9 }
 0x3c8   : > { %s1539_s24 = smov %s1098_s26  ;;  %s1540_s25 = smov %s1102_s27 }
 0x3c9   : > { %s1541_s26 = smov %s1544_s11  ;;  %s1542_s27 = smov %s1548_s8 }
 0x3ca   :  { %21 = sbr.rel (!%p19_p8) target bundleno = 14 (0xe), region = 101 }
 0x3d1   :  { %606 = vsyncpa [#allocation4], 1 }
 0x3d2   :  { %608 = vsyncpa [#allocation4 + $0x1], 1 }
 0x3d3   :  { %609 = vsyncpa [#allocation7], 1 }
 0x3d4   :  { %610 = vsyncpa [#allocation5], 1 }
 0x3d5   :  { %612 = vsyncpa [#allocation5 + $0x1], 1 }

</bundles_post_ra>
